<compile_context>
chip_gen: v7x
topology: tpu7x:2x2x1
jax: 0.10.0
libtpu: 0.0.40
codegen_flags: <defaults>
</compile_context>

<pallas_src>
import jax
import jax.numpy as jnp
from jax.experimental import pallas as pl
from jax.experimental.pallas import tpu as pltpu


def _perm_embed_kernel(x_ref, sel_ref, tbl_ref, o_ref):
    # x_ref:   (bt, P)   int32 -- raw permutation indices (minimal HBM stream)
    # sel_ref: (P,  P*E) f32   -- 0/1 position selector: sel[k, i*E+e] = (k == i)
    # tbl_ref: (P,  P*E) f32   -- row j, segment i = c_perm[j] + pos_emb[i]
    # o_ref:   (bt, P*E)       -- lane-dense output block
    bt, pe = o_ref.shape
    p = tbl_ref.shape[0]

    # Expand indices to the lane layout on the (otherwise idle) MXU:
    #   xe[b, i*E+e] = x[b, i].   Exact: small ints x {0,1} selector in f32.
    xe = jnp.dot(x_ref[...].astype(jnp.float32), sel_ref[...],
                 preferred_element_type=jnp.float32)            # (bt, P*E)

    # Unrolled compare+select gather on the VPU; the positional add is already
    # folded into tbl (wrapper-side) -> ~2*(P-1) VALU ops per element.
    acc = jnp.broadcast_to(tbl_ref[0:1, :], (bt, pe))           # j = 0 init (hoisted)
    for j in range(1, p):                                       # P is small; static unroll
        # (1, PE) static slice; jnp.where broadcasts it across sublanes.
        # (A stride-0 sublane-broadcast load tbl_ref[pl.ds(j, bt, stride=0), :]
        #  would move this broadcast onto the vld slot; omitted for robustness.)
        acc = jnp.where(xe == float(j), tbl_ref[j:j + 1, :], acc)

    o_ref[...] = acc.astype(o_ref.dtype)


def _pick_batch_block(B, cap=1024):
    """Largest batch tile <= cap that divides B and is a multiple of 8.

    Multiple grid steps enable double-buffering and v7x dual-TC sharding while
    bounding per-step VMEM.  Falls back to B (single step) for small/odd B.
    """
    if B <= cap:
        return B
    bt = (cap // 8) * 8
    while bt >= 8:
        if B % bt == 0:
            return bt
        bt -= 8
    return B


def permutation_embedder_forward(x, c_perm, pos_emb, *, batch_block=None,
                                 out_dtype=None):
    """x: (B, P) int indices, c_perm: (P, E), pos_emb: (P, E) -> (B, P, E)."""
    B, P = x.shape
    Pt, E = c_perm.shape
    assert P == Pt and pos_emb.shape == (P, E)
    PE = P * E  # 256 for the toy shapes -> multiple of 128 lanes (unmasked stores)
    out_dtype = c_perm.dtype if out_dtype is None else jnp.dtype(out_dtype)

    bt = _pick_batch_block(B) if batch_block is None else batch_block
    if bt != B:
        assert B % bt == 0 and bt % 8 == 0, \
            "batch_block must divide B and be a multiple of 8"

    # --- wrapper-side, O(P^2*E) one-time layout/constant prep ----------------
    # Folded table: tbl[j, i*E+e] = c_perm[j, e] + pos_emb[i, e]
    tbl = (jnp.tile(c_perm.astype(jnp.float32), (1, P))
           + pos_emb.astype(jnp.float32).reshape(1, PE))          # (P, P*E)
    # Position selector: sel[k, i*E+e] = 1.0 if k == i else 0.0
    lane_pos = jnp.arange(PE, dtype=jnp.int32) // E
    sel = (jnp.arange(P, dtype=jnp.int32)[:, None]
           == lane_pos[None, :]).astype(jnp.float32)              # (P, P*E)
    x_i32 = x.astype(jnp.int32)                                   # minimal index stream

    # --- VMEM budget / explicit limit ----------------------------------------
    per_step_bytes = (bt * P * 4                 # index block
                      + 2 * P * PE * 4           # selector + folded table (resident)
                      + bt * PE * out_dtype.itemsize)
    assert 2 * per_step_bytes <= 24 * 1024 * 1024, \
        "batch_block too large: double-buffered per-step footprint exceeds ~24 MiB"
    vmem_limit = min(64 * 1024 * 1024, max(16 * 1024 * 1024, 4 * per_step_bytes))

    out_flat = pl.pallas_call(
        _perm_embed_kernel,
        out_shape=jax.ShapeDtypeStruct((B, PE), out_dtype),
        grid=(B // bt,),
        in_specs=[
            pl.BlockSpec((bt, P), lambda i: (i, 0)),    # raw indices for this chunk
            pl.BlockSpec((P, PE), lambda i: (0, 0)),    # selector (resident)
            pl.BlockSpec((P, PE), lambda i: (0, 0)),    # folded table (resident)
        ],
        out_specs=pl.BlockSpec((bt, PE), lambda i: (i, 0)),
        compiler_params=pltpu.CompilerParams(
            dimension_semantics=("parallel",),
            vmem_limit_bytes=vmem_limit),
    )(x_i32, sel, tbl)

    # Contiguous, free reshape back to the PyTorch output layout.
    return out_flat.reshape(B, P, E)


if __name__ == "__main__":
    # Small shapes consistent with the module:
    #   n_max_permutation_size = 8, n_embed = 32, batch = 2
    B, P, E = 2, 8, 32
    init_std = 0.02

    key = jax.random.PRNGKey(0)
    k_perm, k_pos, k_x = jax.random.split(key, 3)

    # Deterministic parameter init (matches init_weights: normal with std=init_std).
    c_perm = (init_std * jax.random.normal(k_perm, (P, E))).astype(jnp.float32)
    pos_emb = (init_std * jax.random.normal(k_pos, (P, E))).astype(jnp.float32)

    # Permutation indices per batch element.
    x = jnp.stack(
        [jax.random.permutation(jax.random.fold_in(k_x, b), P) for b in range(B)]
    ).astype(jnp.int32)                                        # (B, P)

    out = permutation_embedder_forward(x, c_perm, pos_emb)
    out = jax.block_until_ready(out)

    # Pure-JAX reference check (gather + positional add).
    ref = c_perm[x] + pos_emb[None, :, :]
    assert out.shape == (B, P, E)
    assert jnp.allclose(out, ref, atol=1e-5, rtol=1e-5)

    print("KERNEL_OK")
</pallas_src>

<mosaic_0001>
module attributes {stable_mosaic.version = 11 : i64} {
  func.func @_perm_embed_kernel(%arg0: i32, %arg1: memref<2x8xi32, #tpu.memory_space<vmem>>, %arg2: memref<8x256xf32, #tpu.memory_space<vmem>>, %arg3: memref<8x256xf32, #tpu.memory_space<vmem>>, %arg4: memref<2x256xf32, #tpu.memory_space<vmem>>) attributes {dimension_semantics = [#tpu.dimension_semantics<parallel>], iteration_bounds = array<i64: 1>, scalar_prefetch = 0 : i64, scratch_operands = 0 : i64, tpu.core_type = #tpu.core_type<tc>, window_params = [{transform_indices = @transform_0, window_bounds = array<i64: 2, 8>}, {pipeline_mode = #tpu.pipeline_mode<synchronous>, transform_indices = @transform_1, window_bounds = array<i64: 8, 256>}, {pipeline_mode = #tpu.pipeline_mode<synchronous>, transform_indices = @transform_2, window_bounds = array<i64: 8, 256>}, {transform_indices = @transform_3, window_bounds = array<i64: 2, 256>}]} {
    %c0 = arith.constant 0 : index
    %c0_0 = arith.constant 0 : index
    %0 = vector.load %arg1[%c0, %c0_0] : memref<2x8xi32, #tpu.memory_space<vmem>>, vector<2x8xi32>
    %1 = arith.sitofp %0 : vector<2x8xi32> to vector<2x8xf32>
    %c0_1 = arith.constant 0 : index
    %c0_2 = arith.constant 0 : index
    %2 = vector.load %arg2[%c0_1, %c0_2] : memref<8x256xf32, #tpu.memory_space<vmem>>, vector<8x256xf32>
    %cst = arith.constant dense<0.000000e+00> : vector<2x256xf32>
    %3 = tpu.matmul %1, %2, %cst {dimension_numbers = #tpu.dot_dimension_numbers<[1], [0], [0], [1], [0, 0, 1, 1], [], []>} : vector<2x8xf32>, vector<8x256xf32>, vector<2x256xf32> -> vector<2x256xf32>
    %c0_3 = arith.constant 0 : index
    %c0_4 = arith.constant 0 : index
    %4 = vector.load %arg3[%c0_3, %c0_4] : memref<8x256xf32, #tpu.memory_space<vmem>>, vector<1x256xf32>
    %5 = vector.shape_cast %4 : vector<1x256xf32> to vector<1x256xf32>
    %6 = vector.broadcast %5 : vector<1x256xf32> to vector<2x256xf32>
    %cst_5 = arith.constant 1.000000e+00 : f32
    %7 = vector.broadcast %cst_5 : f32 to vector<2x256xf32>
    %8 = arith.cmpf oeq, %3, %7 : vector<2x256xf32>
    %c1 = arith.constant 1 : index
    %c0_6 = arith.constant 0 : index
    %9 = vector.load %arg3[%c1, %c0_6] : memref<8x256xf32, #tpu.memory_space<vmem>>, vector<1x256xf32>
    %10 = vector.shape_cast %9 : vector<1x256xf32> to vector<1x256xf32>
    %11 = vector.broadcast %10 : vector<1x256xf32> to vector<2x256xf32>
    %12 = arith.select %8, %11, %6 : vector<2x256xi1>, vector<2x256xf32>
    %cst_7 = arith.constant 2.000000e+00 : f32
    %13 = vector.broadcast %cst_7 : f32 to vector<2x256xf32>
    %14 = arith.cmpf oeq, %3, %13 : vector<2x256xf32>
    %c2 = arith.constant 2 : index
    %c0_8 = arith.constant 0 : index
    %15 = vector.load %arg3[%c2, %c0_8] : memref<8x256xf32, #tpu.memory_space<vmem>>, vector<1x256xf32>
    %16 = vector.shape_cast %15 : vector<1x256xf32> to vector<1x256xf32>
    %17 = vector.broadcast %16 : vector<1x256xf32> to vector<2x256xf32>
    %18 = arith.select %14, %17, %12 : vector<2x256xi1>, vector<2x256xf32>
    %cst_9 = arith.constant 3.000000e+00 : f32
    %19 = vector.broadcast %cst_9 : f32 to vector<2x256xf32>
    %20 = arith.cmpf oeq, %3, %19 : vector<2x256xf32>
    %c3 = arith.constant 3 : index
    %c0_10 = arith.constant 0 : index
    %21 = vector.load %arg3[%c3, %c0_10] : memref<8x256xf32, #tpu.memory_space<vmem>>, vector<1x256xf32>
    %22 = vector.shape_cast %21 : vector<1x256xf32> to vector<1x256xf32>
    %23 = vector.broadcast %22 : vector<1x256xf32> to vector<2x256xf32>
    %24 = arith.select %20, %23, %18 : vector<2x256xi1>, vector<2x256xf32>
    %cst_11 = arith.constant 4.000000e+00 : f32
    %25 = vector.broadcast %cst_11 : f32 to vector<2x256xf32>
    %26 = arith.cmpf oeq, %3, %25 : vector<2x256xf32>
    %c4 = arith.constant 4 : index
    %c0_12 = arith.constant 0 : index
    %27 = vector.load %arg3[%c4, %c0_12] : memref<8x256xf32, #tpu.memory_space<vmem>>, vector<1x256xf32>
    %28 = vector.shape_cast %27 : vector<1x256xf32> to vector<1x256xf32>
    %29 = vector.broadcast %28 : vector<1x256xf32> to vector<2x256xf32>
    %30 = arith.select %26, %29, %24 : vector<2x256xi1>, vector<2x256xf32>
    %cst_13 = arith.constant 5.000000e+00 : f32
    %31 = vector.broadcast %cst_13 : f32 to vector<2x256xf32>
    %32 = arith.cmpf oeq, %3, %31 : vector<2x256xf32>
    %c5 = arith.constant 5 : index
    %c0_14 = arith.constant 0 : index
    %33 = vector.load %arg3[%c5, %c0_14] : memref<8x256xf32, #tpu.memory_space<vmem>>, vector<1x256xf32>
    %34 = vector.shape_cast %33 : vector<1x256xf32> to vector<1x256xf32>
    %35 = vector.broadcast %34 : vector<1x256xf32> to vector<2x256xf32>
    %36 = arith.select %32, %35, %30 : vector<2x256xi1>, vector<2x256xf32>
    %cst_15 = arith.constant 6.000000e+00 : f32
    %37 = vector.broadcast %cst_15 : f32 to vector<2x256xf32>
    %38 = arith.cmpf oeq, %3, %37 : vector<2x256xf32>
    %c6 = arith.constant 6 : index
    %c0_16 = arith.constant 0 : index
    %39 = vector.load %arg3[%c6, %c0_16] : memref<8x256xf32, #tpu.memory_space<vmem>>, vector<1x256xf32>
    %40 = vector.shape_cast %39 : vector<1x256xf32> to vector<1x256xf32>
    %41 = vector.broadcast %40 : vector<1x256xf32> to vector<2x256xf32>
    %42 = arith.select %38, %41, %36 : vector<2x256xi1>, vector<2x256xf32>
    %cst_17 = arith.constant 7.000000e+00 : f32
    %43 = vector.broadcast %cst_17 : f32 to vector<2x256xf32>
    %44 = arith.cmpf oeq, %3, %43 : vector<2x256xf32>
    %c7 = arith.constant 7 : index
    %c0_18 = arith.constant 0 : index
    %45 = vector.load %arg3[%c7, %c0_18] : memref<8x256xf32, #tpu.memory_space<vmem>>, vector<1x256xf32>
    %46 = vector.shape_cast %45 : vector<1x256xf32> to vector<1x256xf32>
    %47 = vector.broadcast %46 : vector<1x256xf32> to vector<2x256xf32>
    %48 = arith.select %44, %47, %42 : vector<2x256xi1>, vector<2x256xf32>
    %c0_19 = arith.constant 0 : index
    %c0_20 = arith.constant 0 : index
    %49 = vector.load %arg4[%c0_19, %c0_20] : memref<2x256xf32, #tpu.memory_space<vmem>>, vector<2x256xf32>
    tpu.vector_store %arg4[%c0_19, %c0_20], %48 {strides = array<i32>} : memref<2x256xf32, #tpu.memory_space<vmem>>, vector<2x256xf32>,
    return
  }
  func.func @transform_0(%arg0: i32) -> (i32, i32) {
    %c0_i32 = arith.constant 0 : i32
    %c0_i32_0 = arith.constant 0 : i32
    return %arg0, %c0_i32 : i32, i32
  }
  func.func @transform_1(%arg0: i32) -> (i32, i32) {
    %c0_i32 = arith.constant 0 : i32
    %c0_i32_0 = arith.constant 0 : i32
    %c0_i32_1 = arith.constant 0 : i32
    return %c0_i32, %c0_i32_0 : i32, i32
  }
  func.func @transform_2(%arg0: i32) -> (i32, i32) {
    %c0_i32 = arith.constant 0 : i32
    %c0_i32_0 = arith.constant 0 : i32
    %c0_i32_1 = arith.constant 0 : i32
    return %c0_i32, %c0_i32_0 : i32, i32
  }
  func.func @transform_3(%arg0: i32) -> (i32, i32) {
    %c0_i32 = arith.constant 0 : i32
    %c0_i32_0 = arith.constant 0 : i32
    return %arg0, %c0_i32 : i32, i32
  }
}

</mosaic_0001>

<bundles_post_ra>
// kernel: tpu_custom_call.1
= control target key start
LH: loop header
LB: loop body
LE: loop exit
PB: predicated region body
PF: predicated region fallthrough
CT: control target
= control target key end

     0   :  { %8 = vsyncpa [#allocation3], 0  ;;  %s462_s0 = inlined_call_operand.hbm [shape: s32[2,8], index: 0, kind: input, shape index: {}]   ;;  %s463_s1 = inlined_call_operand.hbm [shape: f32[8,256], index: 1, kind: input, shape index: {}]   ;;  %s464_s2 = inlined_call_operand.hbm [shape: f32[8,256], index: 2, kind: input, shape index: {}]   ;;  %s465_s3 = inlined_call_operand.hbm [shape: f32[2,256], index: 3, kind: output, shape index: {}]  }
   0x1   :  { %9 = vsyncpa [#allocation6], 0 }
   0x2   :  { %10 = vsyncpa [#allocation4], 0  ;;  %s389_s12 = smov [#allocation5]   ;;  %s390_s14 = smov [#allocation2]  }
   0x3   :  { %s27_s13 = sshll.u32 %s389_s12, 4  ;;  %s17_s15 = sshll.u32 %s390_s14, 4  ;;  %s28_s13 = int_to_ptr.vmem [resolvable:$true] %s27_s13  ;;  %s18_s15 = int_to_ptr.vmem [resolvable:$true] %s17_s15 }
   0x4   :  { %s295_s18 = scalar_lea.hbm %s463_s1, 256 }
   0x5   :  { %p296_p0 = scmp.ne.s32.totalorder %s463_s1, %s295_s18  ;;  %p299_p1 = scmp.lt.u32.totalorder %s295_s18, %s463_s1 }
   0x7   :  { %p301_p2 = pnand %p299_p1, %p296_p0 }
   0x9   :  { %304 = shalt.err (!%p301_p2)
}
   0xa   :  { %s305_s23 = scalar_lea.vmem %s28_s13, 256  ;;  %p310_p4 = scmp.lt.s32.totalorder %s28_s13, %s28_s13 }
   0xb   :  { %p306_p3 = scmp.ne.s32.totalorder %s28_s13, %s305_s23  ;;  %p311_p5 = scmp.lt.s32.totalorder %s305_s23, %s305_s23 }
   0xd   :  { %p312_p6 = por %p311_p5, %p310_p4 }
   0xf   :  { %p313_p7 = pnand %p312_p6, %p306_p3 }
  0x11   :  { %316 = shalt.err (!%p313_p7)
}
  0x12   :  { %30 = dma.hbm_to_vmem [thread:$0]  %s463_s1, 256, %s28_s13, [#allocation6]  }
  0x13   :  { %s317_s28 = scalar_lea.hbm %s462_s0, 32 }
  0x14   :  { %p318_p8 = scmp.ne.s32.totalorder %s462_s0, %s317_s28  ;;  %p321_p9 = scmp.lt.u32.totalorder %s317_s28, %s462_s0 }
  0x16   :  { %p323_p10 = pnand %p321_p9, %p318_p8 }
  0x18   :  { %326 = shalt.err (!%p323_p10)
}
  0x19   :  { %s327_s6 = scalar_lea.vmem %s18_s15, 32  ;;  %p332_p12 = scmp.lt.s32.totalorder %s18_s15, %s18_s15 }
  0x1a   :  { %p328_p11 = scmp.ne.s32.totalorder %s18_s15, %s327_s6  ;;  %p333_p13 = scmp.lt.s32.totalorder %s327_s6, %s327_s6 }
  0x1c   :  { %p334_p0 = por %p333_p13, %p332_p12 }
  0x1e   :  { %p335_p1 = pnand %p334_p0, %p328_p11 }
  0x20   :  { %338 = shalt.err (!%p335_p1)
}
  0x21   :  { %20 = dma.hbm_to_vmem [thread:$0]  %s462_s0, 32, %s18_s15, [#allocation3]  }
  0x22   :  { %s391_s8 = smov [#allocation7]   ;;  %s339_s12 = scalar_lea.hbm %s464_s2, 256 }
  0x23   :  { %s37_s9 = sshll.u32 %s391_s8, 4  ;;  %p340_p2 = scmp.ne.s32.totalorder %s464_s2, %s339_s12  ;;  %s38_s9 = int_to_ptr.vmem [resolvable:$true] %s37_s9 }
  0x24   :  { %p343_p3 = scmp.lt.u32.totalorder %s339_s12, %s464_s2 }
  0x26   :  { %p345_p4 = pnand %p343_p3, %p340_p2 }
  0x28   :  { %348 = shalt.err (!%p345_p4)
}
  0x29   :  { %s349_s18 = scalar_lea.vmem %s38_s9, 256  ;;  %p354_p6 = scmp.lt.s32.totalorder %s38_s9, %s38_s9 }
  0x2a   :  { %p350_p5 = scmp.ne.s32.totalorder %s38_s9, %s349_s18  ;;  %p355_p7 = scmp.lt.s32.totalorder %s349_s18, %s349_s18 }
  0x2c   :  { %p356_p8 = por %p355_p7, %p354_p6 }
  0x2e   :  { %p357_p9 = pnand %p356_p8, %p350_p5 }
  0x30   :  { %360 = shalt.err (!%p357_p9)
}
  0x31   :  { %40 = dma.hbm_to_vmem [thread:$0]  %s464_s2, 256, %s38_s9, [#allocation6]  }
  0x32   :  { %383 = dma.done.wait [#allocation3], 32  }
  0x33   :  { %384 = vsyncadd [#allocation3], 4294967264 }
  0x34   :  { %385 = dma.done.wait [#allocation6], 512  }
  0x35   :  { %386 = vsyncadd [#allocation6], 4294966784  ;;  %v392_v0 = vmov 0.0   ;;  %v53_v1 = vld [vmem:[#allocation5 + $0x8] sm:$0xff]  ;;  %v52_v2 = vld [vmem:[#allocation5] sm:$0xff]  ;;  %vm54_vm0 = vcmask 64512   ;;  %v131_v5 = vlaneseq }
  0x36   :  { %122 = vmatprep.mubr.f32.mxu0 %v392_v0  ;;  %v50_v3 = vld [vmem:[#allocation2] sm:$0x3]  ;;  %58 = vmatprep.subr.mxu0 %v53_v1  ;;  %v129_v9 = vld [vmem:[#allocation7] ss:$8 sm:$0x3]  ;;  %s393_s2 = smov [#allocation8]  }
  0x37   :  { %v51_v4 = vcvt.s32.f32 %v50_v3  ;;  %59 = vmatpush1.msra.mxu0 %v52_v2  ;;  %v132_v6 = vshrl.u32 %v131_v5, 7  ;;  %v144_v10 = vld [vmem:[#allocation7 + $0x1] ss:$8 sm:$0x3]  ;;  %s278_s19 = sshll.u32 %s393_s2, 4  ;;  %s279_s19 = int_to_ptr.vmem [resolvable:$true] %s278_s19 }
  0x38   :  { %v161_v11 = vld [vmem:[#allocation7 + $0x2] ss:$8 sm:$0x3]  ;;  %v178_v12 = vld [vmem:[#allocation7 + $0x3] ss:$8 sm:$0x3]  ;;  %p366_p11 = scmp.lt.s32.totalorder %s279_s19, %s279_s19 }
  0x39   :  { %288 = vmatmul.mubr.msk.f32.vlgmr.msra.gmra.mrb[0].mxu0 %vm54_vm0, %v51_v4  ;;  %v133_v7 = vsub.s32 0, %v132_v6  ;;  %v137_v8 = vsub.s32 1, %v132_v6  ;;  %v195_v13 = vld [vmem:[#allocation7 + $0x4] ss:$8 sm:$0x3]  ;;  %s361_s20 = scalar_lea.vmem %s279_s19, 64 }
  0x3a   :  { %v212_v14 = vld [vmem:[#allocation7 + $0x5] ss:$8 sm:$0x3]  ;;  %v229_v19 = vld [vmem:[#allocation7 + $0x6] ss:$8 sm:$0x3]  ;;  %p362_p10 = scmp.ne.s32.totalorder %s279_s19, %s361_s20  ;;  %p367_p12 = scmp.lt.s32.totalorder %s361_s20, %s361_s20 }
  0x3b   :  { %v134_v15 = vrot.slane %v129_v9, %v133_v7  ;;  %v149_v16 = vrot.slane %v144_v10, %v133_v7  ;;  %v138_v17 = vrot.slane %v129_v9, %v137_v8  ;;  %v153_v18 = vrot.slane %v144_v10, %v137_v8  ;;  %v246_v24 = vld [vmem:[#allocation7 + $0x7] ss:$8 sm:$0x3] }
  0x3c   :  { %v170_v20 = vrot.slane %v161_v11, %v137_v8  ;;  %v166_v21 = vrot.slane %v161_v11, %v133_v7  ;;  %v183_v22 = vrot.slane %v178_v12, %v133_v7  ;;  %v187_v23 = vrot.slane %v178_v12, %v137_v8  ;;  %p368_p13 = por %p367_p12, %p366_p11 }
  0x3d   :  { %v200_v26 = vrot.slane %v195_v13, %v133_v7  ;;  %v204_v27 = vrot.slane %v195_v13, %v137_v8  ;;  %v217_v28 = vrot.slane %v212_v14, %v133_v7  ;;  %v221_v29 = vrot.slane %v212_v14, %v137_v8 }
  0x3e   :  { %v234_v31 = vrot.slane %v229_v19, %v133_v7  ;;  %v238_v32 = vrot.slane %v229_v19, %v137_v8  ;;  %v251_v34 = vrot.slane %v246_v24, %v133_v7  ;;  %v255_v37 = vrot.slane %v246_v24, %v137_v8  ;;  %p369_p0 = pnand %p368_p13, %p362_p10 }
 0x10c   :  { %v124_v25 = vpop.f32.mrb[0].mxu0 }
 0x10d   :  { %vm141_vm1 = vcmp.eq.f32.partialorder %v124_v25, 1.0  ;;  %vm158_vm2 = vcmp.eq.f32.partialorder %v124_v25, 2.0  ;;  %v126_v30 = vpop.f32.mrb[1].mxu0  ;;  %vm175_vm5 = vcmp.eq.f32.partialorder %v124_v25, 3.0  ;;  %vm192_vm7 = vcmp.eq.f32.partialorder %v124_v25, 4.0 }
 0x10e   :  { %v156_v33 = vsel %vm141_vm1, %v149_v16, %v134_v15  ;;  %vm142_vm3 = vcmp.eq.f32.partialorder %v126_v30, 1.0  ;;  %vm159_vm4 = vcmp.eq.f32.partialorder %v126_v30, 2.0  ;;  %vm176_vm6 = vcmp.eq.f32.partialorder %v126_v30, 3.0 }
 0x10f   :  { %v157_v35 = vsel %vm142_vm3, %v153_v18, %v138_v17  ;;  %v173_v36 = vsel %vm158_vm2, %v166_v21, %v156_v33  ;;  %vm193_vm8 = vcmp.eq.f32.partialorder %v126_v30, 4.0  ;;  %vm209_vm9 = vcmp.eq.f32.partialorder %v124_v25, 5.0 }
 0x110   :  { %v174_v38 = vsel %vm159_vm4, %v170_v20, %v157_v35  ;;  %v190_v39 = vsel %vm175_vm5, %v183_v22, %v173_v36  ;;  %vm210_vm10 = vcmp.eq.f32.partialorder %v126_v30, 5.0  ;;  %vm226_vm11 = vcmp.eq.f32.partialorder %v124_v25, 6.0 }
 0x111   :  { %v191_v40 = vsel %vm176_vm6, %v187_v23, %v174_v38  ;;  %v207_v41 = vsel %vm192_vm7, %v200_v26, %v190_v39  ;;  %vm227_vm12 = vcmp.eq.f32.partialorder %v126_v30, 6.0  ;;  %vm243_vm13 = vcmp.eq.f32.partialorder %v124_v25, 7.0 }
 0x112   :  { %v208_v42 = vsel %vm193_vm8, %v204_v27, %v191_v40  ;;  %v224_v43 = vsel %vm209_vm9, %v217_v28, %v207_v41  ;;  %vm244_vm14 = vcmp.eq.f32.partialorder %v126_v30, 7.0 }
 0x113   :  { %v225_v44 = vsel %vm210_vm10, %v221_v29, %v208_v42  ;;  %v241_v45 = vsel %vm226_vm11, %v234_v31, %v224_v43 }
 0x114   :  { %v242_v46 = vsel %vm227_vm12, %v238_v32, %v225_v44  ;;  %v258_v47 = vsel %vm243_vm13, %v251_v34, %v241_v45 }
 0x115   :  { %v259_v48 = vsel %vm244_vm14, %v255_v37, %v242_v46 }
 0x116   :  { %v262_v49 = vcombine.low %v258_v47, %v259_v48 }
 0x118   :  { %289 = vst.sshfl [vmem:[#allocation8] sm:$0x33 pattern:$0x76325410] %v262_v49 }
 0x119   :  { %372 = shalt.err (!%p369_p0)
}
 0x11a   :  { %s373_s23 = scalar_lea.hbm %s465_s3, 64 }
 0x11b   :  { %p374_p1 = scmp.ne.s32.totalorder %s465_s3, %s373_s23  ;;  %p377_p2 = scmp.lt.u32.totalorder %s373_s23, %s465_s3 }
 0x11d   :  { %p379_p3 = pnand %p377_p2, %p374_p1 }
 0x11f   :  { %382 = shalt.err (!%p379_p3)
}
 0x120   :  { %281 = dma.vmem_to_hbm [thread:$0]  %s279_s19, 64, %s465_s3, [#allocation4]  }
 0x121   :  { %387 = dma.done.wait [#allocation4], 64  }
 0x122   :  { %388 = vsyncadd [#allocation4], 4294967232 }
 0x123   :  { %285 = vsyncpa [#allocation3], 1 }
 0x124   :  { %286 = vsyncpa [#allocation6], 1 }
 0x125   :  { %287 = vsyncpa [#allocation4], 1 }

</bundles_post_ra>
